<compile_context>
chip_gen: v7x
topology: tpu7x:2x2x1
jax: 0.10.0
libtpu: 0.0.40
codegen_flags: <defaults>
</compile_context>

<pallas_src>
import numpy as np
import jax
import jax.numpy as jnp
from jax import lax
from jax.experimental import pallas as pl
from jax.experimental.pallas import tpu as pltpu


# ----------------------------------------------------------------------------
# Kernel 1: masked entity mean + masked location means for ALL candidates of one
#           batch element, written time-major -> block (S, 1, C, 4H)
# ----------------------------------------------------------------------------
def masked_concat_kernel(emask_ref, lmask_ref, src_ref, out_ref):
    # emask_ref: (1, S, T) bf16   entity mask
    # lmask_ref: (1, C*S, T) bf16 location masks, candidate axis collapsed
    # src_ref:   (1, T, 2H) bf16  encoder output
    # out_ref:   (S, 1, C, 4H) bf16  time-major decoder input block
    S = emask_ref.shape[1]
    C = out_ref.shape[2]

    emask = emask_ref[0]          # (S, T)
    lmask = lmask_ref[0]          # (C*S, T)
    src = src_ref[0]              # (T, 2H)

    def masked_mean(mask):
        msum = jnp.dot(mask, src, preferred_element_type=jnp.float32)
        cnt = jnp.sum(mask.astype(jnp.float32), axis=-1, keepdims=True)
        # safe divide: 0/0 -> 0 (matches the torch isnan masked_fill)
        return jnp.where(cnt > 0, msum / jnp.where(cnt > 0, cnt, 1.0), 0.0)

    e_mean = masked_mean(emask)   # (S, 2H)   computed once per batch element
    l_mean = masked_mean(lmask)   # (C*S, 2H) one MXU matmul for all candidates

    # Build the (S, C, 4H) time-major block (static loop over the C candidates;
    # 4H is a multiple of 128 so the lane concat boundary stays vreg-friendly).
    parts = []
    for c in range(C):
        l_c = l_mean[c * S:(c + 1) * S, :]                       # (S, 2H) static slice
        parts.append(jnp.concatenate([e_mean, l_c], axis=-1))    # (S, 4H)
    block = jnp.stack(parts, axis=1)[:, None]                    # (S, 1, C, 4H)
    out_ref[...] = block.astype(out_ref.dtype)


# ----------------------------------------------------------------------------
# Kernel 2: fused bidirectional LSTM (single hoisted input projection for both
#           directions, fused fwd/bwd recurrence) + Hidden2Score linear,
#           lane-dense (N, S_pad) output.
# Gate column order is [i | f | o | g] (permuted in the wrapper).
# ----------------------------------------------------------------------------
def bilstm_score_kernel(x_ref,                                   # (S*N, 4H) bf16
                        wih_ref, b_ref,                          # (4H, 8H) bf16, (1, 8H) f32
                        whh_f_ref, whh_b_ref,                    # (H, 4H) bf16 each
                        wsc_f_ref, wsc_b_ref, bsc_ref,           # score weights
                        out_ref,                                 # (N, S_pad) f32
                        gin,                                     # (S*N, 8H) f32 scratch
                        hs_f, hs_b,                              # (S, N, H)  f32 scratch
                        h_f, c_f, h_b, c_b):                     # (N, H)     f32 scratch
    S, N, H = hs_f.shape
    H3 = 3 * H
    H4 = 4 * H

    # ---- hoisted input projection: ONE wide MXU matmul covers both directions ----
    gin[...] = (jnp.dot(x_ref[...], wih_ref[...], preferred_element_type=jnp.float32)
                + b_ref[...])                                    # (S*N, 8H) = [fwd | bwd]

    whh_f = whh_f_ref[...]                                       # (H, 4H) bf16
    whh_b = whh_b_ref[...]

    zero = jnp.zeros((N, H), jnp.float32)
    h_f[...] = zero; c_f[...] = zero
    h_b[...] = zero; c_b[...] = zero

    # ---- fused forward/backward recurrence (independent chains interleave) ----
    def body(i, carry):
        t_f = i
        t_b = S - 1 - i
        rf = pl.multiple_of(t_f * N, N)
        rb = pl.multiple_of(t_b * N, N)

        # fwd gates come from lanes [0, 4H), bwd gates from lanes [4H, 8H)
        g_f = gin[pl.ds(rf, N), :H4] + jnp.dot(
            h_f[...].astype(jnp.bfloat16), whh_f, preferred_element_type=jnp.float32)
        g_b = gin[pl.ds(rb, N), H4:] + jnp.dot(
            h_b[...].astype(jnp.bfloat16), whh_b, preferred_element_type=jnp.float32)

        # gates ordered [i | f | o | g]: one sigmoid over a contiguous 3H slab,
        # one tanh over the trailing H slab.
        s_f = jax.nn.sigmoid(g_f[:, :H3]); g_fg = jnp.tanh(g_f[:, H3:])
        s_b = jax.nn.sigmoid(g_b[:, :H3]); g_bg = jnp.tanh(g_b[:, H3:])

        c_fn = s_f[:, H:2 * H] * c_f[...] + s_f[:, :H] * g_fg
        h_fn = s_f[:, 2 * H:] * jnp.tanh(c_fn)
        c_bn = s_b[:, H:2 * H] * c_b[...] + s_b[:, :H] * g_bg
        h_bn = s_b[:, 2 * H:] * jnp.tanh(c_bn)

        c_f[...] = c_fn; h_f[...] = h_fn; hs_f[t_f] = h_fn
        c_b[...] = c_bn; h_b[...] = h_bn; hs_b[t_b] = h_bn
        return carry

    lax.fori_loop(0, S, body, 0, unroll=True)

    # ---- Hidden2Score: logit[n, t] = h_fwd[t,n].wf + h_bwd[t,n].wb + b ----
    hf = hs_f[...]                       # (S, N, H)
    hb = hs_b[...]
    wf = wsc_f_ref[...][None]            # (1, 1, H)
    wb = wsc_b_ref[...][None]
    logits_sn = jnp.sum(hf * wf, axis=-1) + jnp.sum(hb * wb, axis=-1)   # (S, N)
    logits_ns = jnp.transpose(logits_sn) + bsc_ref[...]                 # (N, S)

    S_pad = out_ref.shape[1]
    if S_pad > S:                        # lane-dense padded store
        logits_ns = jnp.concatenate(
            [logits_ns, jnp.zeros((N, S_pad - S), jnp.float32)], axis=-1)
    out_ref[...] = logits_ns.astype(out_ref.dtype)


# ----------------------------------------------------------------------------
# Wrapper
# ----------------------------------------------------------------------------
def location_predictor_forward(encoder_out, entity_mask, loc_mask, params):
    B, T, H2 = encoder_out.shape
    H = H2 // 2
    C, S = loc_mask.shape[1], loc_mask.shape[2]
    N = B * C
    S_pad = ((S + 127) // 128) * 128          # lane-dense logits width

    enc_bf = encoder_out.astype(jnp.bfloat16)
    emask_bf = entity_mask.astype(jnp.bfloat16)                    # 0/1 exact in bf16
    lmask_bf = loc_mask.reshape(B, C * S, T).astype(jnp.bfloat16)  # free collapse

    # ---- kernel 1: masked means + concat, written time-major (S, B, C, 4H) ----
    decoder_in = pl.pallas_call(
        masked_concat_kernel,
        out_shape=jax.ShapeDtypeStruct((S, B, C, 4 * H), jnp.bfloat16),
        grid=(B,),
        in_specs=[
            pl.BlockSpec((1, S, T), lambda b: (b, 0, 0)),
            pl.BlockSpec((1, C * S, T), lambda b: (b, 0, 0)),
            pl.BlockSpec((1, T, 2 * H), lambda b: (b, 0, 0)),
        ],
        out_specs=pl.BlockSpec((S, 1, C, 4 * H), lambda b: (0, b, 0, 0)),
        compiler_params=pltpu.CompilerParams(
            dimension_semantics=("parallel",)),
    )(emask_bf, lmask_bf, enc_bf)

    # free contiguous collapse: row index = t*N + (b*C + c)  -> time-major (S*N, 4H)
    x_tm = decoder_in.reshape(S * N, 4 * H)

    vmem = pl.BlockSpec(memory_space=pltpu.MemorySpace.VMEM)
    logits_pad = pl.pallas_call(
        bilstm_score_kernel,
        out_shape=jax.ShapeDtypeStruct((N, S_pad), jnp.float32),
        in_specs=[vmem] * 8,
        out_specs=vmem,
        scratch_shapes=[
            pltpu.VMEM((S * N, 8 * H), jnp.float32),   # fused fwd|bwd input projection
            pltpu.VMEM((S, N, H), jnp.float32),        # fwd hidden states
            pltpu.VMEM((S, N, H), jnp.float32),        # bwd hidden states
            pltpu.VMEM((N, H), jnp.float32),           # h fwd carry
            pltpu.VMEM((N, H), jnp.float32),           # c fwd carry
            pltpu.VMEM((N, H), jnp.float32),           # h bwd carry
            pltpu.VMEM((N, H), jnp.float32),           # c bwd carry
        ],
        compiler_params=pltpu.CompilerParams(vmem_limit_bytes=32 * 1024 * 1024),
    )(x_tm,
      params["wih"], params["b"],
      params["whh_f"], params["whh_b"],
      params["wsc_f"], params["wsc_b"], params["bsc"])

    return logits_pad[:, :S].reshape(B, C, S)


def prepare_kernel_params(p, H):
    """Kernel-layout params: gate columns permuted i,f,g,o -> i,f,o,g; the fwd/bwd
    input-projection weights are concatenated along lanes into one (4H, 8H) matrix;
    MXU operands bf16, biases/score weights f32."""
    def perm(w):
        return jnp.concatenate(
            [w[..., :H], w[..., H:2 * H], w[..., 3 * H:], w[..., 2 * H:3 * H]], axis=-1)
    wih = jnp.concatenate([perm(p["wih_f"]), perm(p["wih_b"])], axis=-1)   # (4H, 8H)
    b = jnp.concatenate([perm(p["b_f"]), perm(p["b_b"])], axis=-1)         # (1, 8H)
    return {
        "wih":   wih.astype(jnp.bfloat16),
        "b":     b.astype(jnp.float32),
        "whh_f": perm(p["whh_f"]).astype(jnp.bfloat16),
        "whh_b": perm(p["whh_b"]).astype(jnp.bfloat16),
        "wsc_f": p["wsc_f"].astype(jnp.float32),
        "wsc_b": p["wsc_b"].astype(jnp.float32),
        "bsc":   p["bsc"].astype(jnp.float32),
    }


# ----------------------------------------------------------------------------
# Pure-JAX reference (mirrors the PyTorch forward, eval mode; torch gate order)
# ----------------------------------------------------------------------------
def reference_forward(encoder_out, entity_mask, loc_mask, params, H):
    B, T, _ = encoder_out.shape
    C, S = loc_mask.shape[1], loc_mask.shape[2]

    def safe_div(num, cnt):
        return jnp.where(cnt > 0, num / jnp.where(cnt > 0, cnt, 1.0), 0.0)

    e_sum = jnp.einsum('bst,btd->bsd', entity_mask, encoder_out)
    e_rep = safe_div(e_sum, entity_mask.sum(-1, keepdims=True))          # (B,S,2H)
    l_sum = jnp.einsum('bcst,btd->bcsd', loc_mask, encoder_out)
    l_rep = safe_div(l_sum, loc_mask.sum(-1, keepdims=True))             # (B,C,S,2H)
    e_rep = jnp.broadcast_to(e_rep[:, None], l_rep.shape)
    x = jnp.concatenate([e_rep, l_rep], axis=-1).reshape(B * C, S, 4 * H)

    def lstm_dir(x, wih, whh, b, reverse):
        N = x.shape[0]
        h = jnp.zeros((N, H), jnp.float32)
        c = jnp.zeros((N, H), jnp.float32)
        outs = [None] * S
        order = range(S - 1, -1, -1) if reverse else range(S)
        for t in order:
            g = x[:, t] @ wih + h @ whh + b
            i_g = jax.nn.sigmoid(g[:, :H])
            f_g = jax.nn.sigmoid(g[:, H:2 * H])
            g_g = jnp.tanh(g[:, 2 * H:3 * H])
            o_g = jax.nn.sigmoid(g[:, 3 * H:])
            c = f_g * c + i_g * g_g
            h = o_g * jnp.tanh(c)
            outs[t] = h
        return jnp.stack(outs, axis=1)                                   # (N,S,H)

    hf = lstm_dir(x, params["wih_f"], params["whh_f"], params["b_f"], False)
    hb = lstm_dir(x, params["wih_b"], params["whh_b"], params["b_b"], True)
    dec = jnp.concatenate([hf, hb], axis=-1)                             # (N,S,2H)
    w = jnp.concatenate([params["wsc_f"], params["wsc_b"]], axis=-1)     # (1,2H)
    logits = dec @ w[0] + params["bsc"][0, 0]                            # (N,S)
    return logits.reshape(B, C, S)


# ----------------------------------------------------------------------------
if __name__ == "__main__":
    B, C, S, T, H = 2, 4, 8, 16, 32   # batch, cands, sents, tokens, hidden_size

    key = jax.random.PRNGKey(0)
    ks = jax.random.split(key, 16)

    # --- deterministic parameter init (shapes from nn.LSTM / nn.Linear) ---
    kk = 1.0 / np.sqrt(H)

    def uni(k_, shape):
        return jax.random.uniform(k_, shape, jnp.float32, -kk, kk)

    # PyTorch LSTM params: weight_ih (4H, 4H_in), weight_hh (4H, H), biases (4H,)
    w_ih_f = uni(ks[0], (4 * H, 4 * H)); w_hh_f = uni(ks[1], (4 * H, H))
    b_ih_f = uni(ks[2], (4 * H,));       b_hh_f = uni(ks[3], (4 * H,))
    w_ih_b = uni(ks[4], (4 * H, 4 * H)); w_hh_b = uni(ks[5], (4 * H, H))
    b_ih_b = uni(ks[6], (4 * H,));       b_hh_b = uni(ks[7], (4 * H,))

    # Hidden2Score: Linear(2H -> 1), xavier_normal_ weight, default-uniform bias
    xavier_std = np.sqrt(2.0 / (2 * H + 1))
    score_w = jax.random.normal(ks[8], (1, 2 * H), jnp.float32) * xavier_std
    kb = 1.0 / np.sqrt(2 * H)
    score_b = jax.random.uniform(ks[9], (1,), jnp.float32, -kb, kb)

    # reference params (torch gate order i,f,g,o)
    ref_params = {
        "wih_f": w_ih_f.T, "whh_f": w_hh_f.T, "b_f": (b_ih_f + b_hh_f)[None, :],
        "wih_b": w_ih_b.T, "whh_b": w_hh_b.T, "b_b": (b_ih_b + b_hh_b)[None, :],
        "wsc_f": score_w[:, :H], "wsc_b": score_w[:, H:],
        "bsc": score_b.reshape(1, 1),
    }
    kparams = prepare_kernel_params(ref_params, H)

    # --- deterministic inputs ---
    encoder_out = jax.random.normal(ks[10], (B, T, 2 * H), jnp.float32)
    entity_mask = jax.random.bernoulli(ks[11], 0.5, (B, S, T)).astype(jnp.float32)
    loc_mask = jax.random.bernoulli(ks[12], 0.5, (B, C, S, T)).astype(jnp.float32)
    # exercise the all-masked (0/0 -> 0) path
    entity_mask = entity_mask.at[:, -1, :].set(0.0)
    loc_mask = loc_mask.at[:, 0, -1, :].set(0.0)

    logits = location_predictor_forward(encoder_out, entity_mask, loc_mask, kparams)
    jax.block_until_ready(logits)
    assert logits.shape == (B, C, S), logits.shape

    ref = reference_forward(encoder_out, entity_mask, loc_mask, ref_params, H)
    max_err = float(np.max(np.abs(np.asarray(logits) - np.asarray(ref))))
    # bf16 MXU operands with f32 accumulation / f32 carries -> loose-ish tolerance
    assert np.allclose(np.asarray(logits), np.asarray(ref), atol=3e-2, rtol=3e-2), max_err

    print("KERNEL_OK")
</pallas_src>

<mosaic_0001>
module attributes {stable_mosaic.version = 11 : i64} {
  func.func @masked_concat_kernel(%arg0: i32, %arg1: memref<1x8x16xbf16, #tpu.memory_space<vmem>>, %arg2: memref<1x32x16xbf16, #tpu.memory_space<vmem>>, %arg3: memref<1x16x64xbf16, #tpu.memory_space<vmem>>, %arg4: memref<8x1x4x128xbf16, #tpu.memory_space<vmem>>) attributes {dimension_semantics = [#tpu.dimension_semantics<parallel>], iteration_bounds = array<i64: 2>, scalar_prefetch = 0 : i64, scratch_operands = 0 : i64, tpu.core_type = #tpu.core_type<tc>, window_params = [{transform_indices = @transform_0, window_bounds = array<i64: 1, 8, 16>}, {transform_indices = @transform_1, window_bounds = array<i64: 1, 32, 16>}, {transform_indices = @transform_2, window_bounds = array<i64: 1, 16, 64>}, {transform_indices = @transform_3, window_bounds = array<i64: 8, 1, 4, 128>}]} {
    %c0 = arith.constant 0 : index
    %c0_0 = arith.constant 0 : index
    %c0_1 = arith.constant 0 : index
    %0 = vector.load %arg1[%c0, %c0_0, %c0_1] : memref<1x8x16xbf16, #tpu.memory_space<vmem>>, vector<1x8x16xbf16>
    %1 = vector.shape_cast %0 : vector<1x8x16xbf16> to vector<8x16xbf16>
    %c0_2 = arith.constant 0 : index
    %c0_3 = arith.constant 0 : index
    %c0_4 = arith.constant 0 : index
    %2 = vector.load %arg2[%c0_2, %c0_3, %c0_4] : memref<1x32x16xbf16, #tpu.memory_space<vmem>>, vector<1x32x16xbf16>
    %3 = vector.shape_cast %2 : vector<1x32x16xbf16> to vector<32x16xbf16>
    %c0_5 = arith.constant 0 : index
    %c0_6 = arith.constant 0 : index
    %c0_7 = arith.constant 0 : index
    %4 = vector.load %arg3[%c0_5, %c0_6, %c0_7] : memref<1x16x64xbf16, #tpu.memory_space<vmem>>, vector<1x16x64xbf16>
    %5 = vector.shape_cast %4 : vector<1x16x64xbf16> to vector<16x64xbf16>
    %cst = arith.constant dense<0.000000e+00> : vector<8x64xf32>
    %6 = tpu.matmul %1, %5, %cst {dimension_numbers = #tpu.dot_dimension_numbers<[1], [0], [0], [1], [0, 0, 1, 1], [], []>} : vector<8x16xbf16>, vector<16x64xbf16>, vector<8x64xf32> -> vector<8x64xf32>
    %7 = arith.extf %1 : vector<8x16xbf16> to vector<8x16xf32>
    %cst_8 = arith.constant dense<0.000000e+00> : vector<8xf32>
    %8 = vector.multi_reduction <add>, %7, %cst_8 [1] : vector<8x16xf32> to vector<8xf32>
    %9 = vector.shape_cast %8 : vector<8xf32> to vector<8x1xf32>
    %cst_9 = arith.constant 0.000000e+00 : f32
    %10 = vector.broadcast %cst_9 : f32 to vector<8x1xf32>
    %11 = arith.cmpf ogt, %9, %10 : vector<8x1xf32>
    %cst_10 = arith.constant 0.000000e+00 : f32
    %12 = vector.broadcast %cst_10 : f32 to vector<8x1xf32>
    %13 = arith.cmpf ogt, %9, %12 : vector<8x1xf32>
    %cst_11 = arith.constant 1.000000e+00 : f32
    %14 = vector.broadcast %cst_11 : f32 to vector<8x1xf32>
    %15 = arith.select %13, %9, %14 : vector<8x1xi1>, vector<8x1xf32>
    %16 = vector.broadcast %15 : vector<8x1xf32> to vector<8x64xf32>
    %17 = arith.divf %6, %16 : vector<8x64xf32>
    %cst_12 = arith.constant 0.000000e+00 : f32
    %18 = vector.shape_cast %11 : vector<8x1xi1> to vector<8x1xi1>
    %19 = vector.broadcast %18 : vector<8x1xi1> to vector<8x64xi1>
    %20 = vector.broadcast %cst_12 : f32 to vector<8x64xf32>
    %21 = arith.select %19, %17, %20 : vector<8x64xi1>, vector<8x64xf32>
    %cst_13 = arith.constant dense<0.000000e+00> : vector<32x64xf32>
    %22 = tpu.matmul %3, %5, %cst_13 {dimension_numbers = #tpu.dot_dimension_numbers<[1], [0], [0], [1], [0, 0, 1, 1], [], []>} : vector<32x16xbf16>, vector<16x64xbf16>, vector<32x64xf32> -> vector<32x64xf32>
    %23 = arith.extf %3 : vector<32x16xbf16> to vector<32x16xf32>
    %cst_14 = arith.constant dense<0.000000e+00> : vector<32xf32>
    %24 = vector.multi_reduction <add>, %23, %cst_14 [1] : vector<32x16xf32> to vector<32xf32>
    %25 = vector.shape_cast %24 : vector<32xf32> to vector<32x1xf32>
    %cst_15 = arith.constant 0.000000e+00 : f32
    %26 = vector.broadcast %cst_15 : f32 to vector<32x1xf32>
    %27 = arith.cmpf ogt, %25, %26 : vector<32x1xf32>
    %cst_16 = arith.constant 0.000000e+00 : f32
    %28 = vector.broadcast %cst_16 : f32 to vector<32x1xf32>
    %29 = arith.cmpf ogt, %25, %28 : vector<32x1xf32>
    %cst_17 = arith.constant 1.000000e+00 : f32
    %30 = vector.broadcast %cst_17 : f32 to vector<32x1xf32>
    %31 = arith.select %29, %25, %30 : vector<32x1xi1>, vector<32x1xf32>
    %32 = vector.broadcast %31 : vector<32x1xf32> to vector<32x64xf32>
    %33 = arith.divf %22, %32 : vector<32x64xf32>
    %cst_18 = arith.constant 0.000000e+00 : f32
    %34 = vector.shape_cast %27 : vector<32x1xi1> to vector<32x1xi1>
    %35 = vector.broadcast %34 : vector<32x1xi1> to vector<32x64xi1>
    %36 = vector.broadcast %cst_18 : f32 to vector<32x64xf32>
    %37 = arith.select %35, %33, %36 : vector<32x64xi1>, vector<32x64xf32>
    %38 = vector.extract_strided_slice %37 {offsets = [0, 0], sizes = [8, 64], strides = [1, 1]} : vector<32x64xf32> to vector<8x64xf32>
    %39 = tpu.concatenate %21, %38 in 1 : vector<8x64xf32>, vector<8x64xf32> -> vector<8x128xf32>
    %40 = vector.extract_strided_slice %37 {offsets = [8, 0], sizes = [8, 64], strides = [1, 1]} : vector<32x64xf32> to vector<8x64xf32>
    %41 = tpu.concatenate %21, %40 in 1 : vector<8x64xf32>, vector<8x64xf32> -> vector<8x128xf32>
    %42 = vector.extract_strided_slice %37 {offsets = [16, 0], sizes = [8, 64], strides = [1, 1]} : vector<32x64xf32> to vector<8x64xf32>
    %43 = tpu.concatenate %21, %42 in 1 : vector<8x64xf32>, vector<8x64xf32> -> vector<8x128xf32>
    %44 = vector.extract_strided_slice %37 {offsets = [24, 0], sizes = [8, 64], strides = [1, 1]} : vector<32x64xf32> to vector<8x64xf32>
    %45 = tpu.concatenate %21, %44 in 1 : vector<8x64xf32>, vector<8x64xf32> -> vector<8x128xf32>
    %46 = vector.shape_cast %39 : vector<8x128xf32> to vector<8x1x128xf32>
    %47 = vector.shape_cast %41 : vector<8x128xf32> to vector<8x1x128xf32>
    %48 = vector.shape_cast %43 : vector<8x128xf32> to vector<8x1x128xf32>
    %49 = vector.shape_cast %45 : vector<8x128xf32> to vector<8x1x128xf32>
    %50 = tpu.concatenate %46, %47, %48, %49 in 1 : vector<8x1x128xf32>, vector<8x1x128xf32>, vector<8x1x128xf32>, vector<8x1x128xf32> -> vector<8x4x128xf32>
    %51 = vector.shape_cast %50 : vector<8x4x128xf32> to vector<8x1x4x128xf32>
    %52 = arith.truncf %51 : vector<8x1x4x128xf32> to vector<8x1x4x128xbf16>
    %c0_19 = arith.constant 0 : index
    %c0_20 = arith.constant 0 : index
    %c0_21 = arith.constant 0 : index
    %c0_22 = arith.constant 0 : index
    %53 = vector.load %arg4[%c0_19, %c0_20, %c0_21, %c0_22] : memref<8x1x4x128xbf16, #tpu.memory_space<vmem>>, vector<8x1x4x128xbf16>
    tpu.vector_store %arg4[%c0_19, %c0_20, %c0_21, %c0_22], %52 {strides = array<i32>} : memref<8x1x4x128xbf16, #tpu.memory_space<vmem>>, vector<8x1x4x128xbf16>,
    return
  }
  func.func @transform_0(%arg0: i32) -> (i32, i32, i32) {
    %c0_i32 = arith.constant 0 : i32
    %c0_i32_0 = arith.constant 0 : i32
    %c0_i32_1 = arith.constant 0 : i32
    return %arg0, %c0_i32, %c0_i32_0 : i32, i32, i32
  }
  func.func @transform_1(%arg0: i32) -> (i32, i32, i32) {
    %c0_i32 = arith.constant 0 : i32
    %c0_i32_0 = arith.constant 0 : i32
    %c0_i32_1 = arith.constant 0 : i32
    return %arg0, %c0_i32, %c0_i32_0 : i32, i32, i32
  }
  func.func @transform_2(%arg0: i32) -> (i32, i32, i32) {
    %c0_i32 = arith.constant 0 : i32
    %c0_i32_0 = arith.constant 0 : i32
    %c0_i32_1 = arith.constant 0 : i32
    return %arg0, %c0_i32, %c0_i32_0 : i32, i32, i32
  }
  func.func @transform_3(%arg0: i32) -> (i32, i32, i32, i32) {
    %c0_i32 = arith.constant 0 : i32
    %c0_i32_0 = arith.constant 0 : i32
    %c0_i32_1 = arith.constant 0 : i32
    %c0_i32_2 = arith.constant 0 : i32
    return %c0_i32, %arg0, %c0_i32_0, %c0_i32_1 : i32, i32, i32, i32
  }
}

</mosaic_0001>

<bundles_post_ra>
// kernel: tpu_custom_call.1
= control target key start
LH: loop header
LB: loop body
LE: loop exit
PB: predicated region body
PF: predicated region fallthrough
CT: control target
= control target key end

     0   :  { %8 = vsyncpa [#allocation3], 0  ;;  %s1325_s0 = inlined_call_operand.vmem [shape: bf16[2,8,16], index: 0, kind: input, shape index: {}]   ;;  %s1326_s1 = inlined_call_operand.vmem [shape: bf16[2,32,16], index: 1, kind: input, shape index: {}]   ;;  %s1327_s2 = inlined_call_operand.vmem [shape: bf16[2,16,64], index: 2, kind: input, shape index: {}]   ;;  %s1328_s3 = inlined_call_operand.hbm [shape: bf16[8,2,4,128], index: 3, kind: output, shape index: {}]  }
   0x1   :  { %10 = vsyncpa [#allocation3 + $0x1], 0  ;;  %s1065_s12 = smov 0   ;;  %s1067_s13 = smov 0  }
   0x2   :  { %s1069_s14 = smov 0   ;;  %s1071_s15 = smov 0  }
   0x3 LB: > { %s1086_s16 = sadd.s32 4294967295, %s1036_s15   ;;  %s875_s17 = sadd.s32 4294967294, %s1036_s15   ;;  %s1036_s15 = sphi %s1071_s15, %s1334_s15   ;;  %s1032_s14 = sphi %s1069_s14, %s1333_s14   ;;  %s1028_s13 = sphi %s1067_s13, %s1332_s13   ;;  %s1024_s12 = sphi %s1065_s12, %s1331_s12  }
   0x4   : > { %s1090_s18 = sadd.s32 1, %s1036_s15   ;;  %s101_s19 = sadd.s32 1, %s1032_s14 }
   0x5   : > { %s98_s20 = ssub.s32 %s1036_s15, %s1090_s18  ;;  %p111_p0 = scmp.ne.s32.totalorder %s1032_s14, %s1028_s13 }
   0x6   : > { %p99_p1 = scmp.eq.s32.totalorder %s98_s20, 0  ;;  %p112_p2 = scmp.eq.s32.totalorder %s1086_s16, 1 }
   0x7   : > { %p117_p3 = scmp.ne.s32.totalorder %s1028_s13, %s1024_s12  ;;  %p118_p4 = scmp.eq.s32.totalorder %s875_s17, 1 }
   0x8   : > { %s1101_s21 = scalar_select %p99_p1, %s1032_s14, %s101_s19  }
   0x9   : > { %p1103_p5 = por %p112_p2, %p111_p0  ;;  %p1107_p6 = por %p118_p4, %p117_p3 }
   0xa   : > { %p878_p7 = scmp.ge.s32.totalorder %s1036_s15, 1  ;;  %p159_p8 = scmp.lt.s32.totalorder %s1036_s15, 3 }
   0xc   : > { %p160_p9 = pnand %p878_p7, %p159_p8 }
   0xd   : > { %p192_p10 = scmp.lt.s32.totalorder (!%p160_p9), %s1086_s16, 1  ;;  %v1038_v0 = vmov (!%p160_p9), 0.0   ;;  %vm1039_vm0 = vmmov (!%p160_p9), 0   ;;  %vm220_vm1 = vcmask (!%p160_p9), 130048   ;;  %s1040_s10 = smov (!%p160_p9), 64   ;;  %v410_v47 = vlaneseq (!%p160_p9) }
   0xe   : > { %163 = sbr.rel (%p160_p9) target bundleno = 409 (0x199), region = 32  ;;  %902 = vmatprep.subr.bf16.mxu0 (!%p160_p9), %v1038_v0  ;;  %904 = vmatprep.mubr.msk.bf16.mxu0 (!%p160_p9), %vm1039_vm0, %v1038_v0  ;;  %v1041_v45 = vmov (!%p160_p9), 1966171168   ;;  %vm388_vm7 = vcmask (!%p160_p9), 523264   ;;  %vm733_vm8 = vcmask (!%p160_p9), 1040384   ;;  %vm742_vm9 = vcmask (!%p160_p9), 1041408  }
   0xf   : > { %v408_v46 = vunpack.c.l.s4 (!%p160_p9), %v1041_v45  ;;  %v411_v50 = vshrl.u32 (!%p160_p9), %v410_v47, 7  ;;  %vm751_vm10 = vcmask (!%p160_p9), 1042432   ;;  %s189_s11 = sand.u32 (!%p160_p9), 1, %s1028_s13   ;;  %s892_s19 = sshll.u32 (!%p160_p9), %s1086_s16, 5 }
  0x10   : > { %s879_s17 = sshll.u32 (!%p160_p9), %s189_s11, 4  ;;  %s1283_s27 = scalar_lea.sflag (!%p160_p9), [#allocation3], %s189_s11 }
  0x11   : > { %v409_v49 = vunpack.c.0.s8 (!%p160_p9), %v408_v46  ;;  %s191_s20 = scalar_lea.vmem (!%p160_p9), [#allocation2], %s879_s17 }
  0x13   : > { %v1144_v52 = vsub.s32 (!%p160_p9), %v409_v49, %v411_v50 }
  0x15   : > { %s193_s24 = scalar_select %p192_p10, %s1086_s16, 1 }
  0x17   : > { %s896_s25 = sshll.u32 %s193_s24, 3  ;;  %s895_s26 = sshll.u32 %s193_s24, 4 }
  0x18   : > { %s205_s29 = scalar_lea.vmem %s1327_s2, %s896_s25  ;;  %s200_s5 = scalar_lea.vmem %s1326_s1, %s895_s26 }
  0x19   : > { %v959_v1 = vld [vmem:[%s205_s29] sm:$0xff]   ;;  %s880_s6 = sshll.u32 %s193_s24, 2  ;;  %v210_v3 = vld [vmem:[%s200_s5 + $0x8] sm:$0xff]   ;;  %s789_s24 = sshll.u32 %s191_s20, 4  ;;  %s1279_s24 = int_to_ptr.vmem [resolvable:$true] %s789_s24 }
  0x1a   : > { %v208_v2 = vld [vmem:[%s200_s5] sm:$0xff]   ;;  %s195_s9 = scalar_lea.vmem %s1325_s0, %s880_s6  ;;  %908 = vmatprep.subr.bf16.mxu1 %v959_v1  ;;  %903 = vmatpush3.bf16.msra.mxu0 %v959_v1  ;;  %v342_v6 = vunpack.c.l.bf16 %v210_v3  ;;  %v343_v7 = vunpack.c.h.bf16 %v210_v3  ;;  %s1277_s26 = scalar_lea.hbm %s1328_s3, %s892_s19 }
  0x1b   : > { %v341_v4 = vunpack.c.h.bf16 %v208_v2  ;;  %v340_v5 = vunpack.c.l.bf16 %v208_v2  ;;  %909 = vmatpush3.bf16.msra.mxu1 %v959_v1  ;;  %v207_v8 = vld [vmem:[%s195_s9] sm:$0xf]  ;;  %910 = vmatprep.mubr.msk.bf16.mxu1 %vm220_vm1, %v208_v2  ;;  %v1154_v1 = vsub.s32 0, %v411_v50  ;;  %s974_s28 = scalar_lea.vmem %s1279_s24, 256  ;;  %s1042_s29 = smov [#allocation2]  }
  0x1c   : > { %v350_v11 = vsel %vm220_vm1, %v342_v6, 0.0  ;;  %v353_v12 = vsel %vm220_vm1, %v343_v7, 0.0  ;;  %v264_v13 = vunpack.c.l.bf16 %v207_v8  ;;  %p975_p11 = scmp.ne.s32.totalorder %s1279_s24, %s974_s28  ;;  %s978_s30 = sshll.u32 %s1042_s29, 4  ;;  %s979_s30 = int_to_ptr.vmem [resolvable:$false] %s978_s30 }
  0x1d   : > { %v347_v9 = vsel %vm220_vm1, %v341_v4, 0.0  ;;  %v344_v10 = vsel %vm220_vm1, %v340_v5, 0.0  ;;  %905 = vmatmul.mubr.msk.bf16.vlgmr.msra.gmra.mrb[0].mxu0 %vm220_vm1, %v207_v8  ;;  %s980_s4 = scalar_lea.vmem %s979_s30, 512  ;;  %p981_p0 = scmp.lt.s32.totalorder %s1279_s24, %s979_s30 }
  0x1e   : > { %348 = vadd.xlane.f32.xlu0 %v347_v9  ;;  %345 = vadd.xlane.f32.xlu1 %v344_v10  ;;  %v265_v14 = vsel %vm220_vm1, %v264_v13, 0.0  ;;  %p976_p12 = pnand %p975_p11, %p1103_p5  ;;  %p982_p1 = scmp.lt.s32.totalorder %s980_s4, %s974_s28 }
  0x1f   : > { %911 = vmatmul.mubr.msk.bf16.vlgmr.msra.gmra.mrb[0].mxu1 %vm220_vm1, %v210_v3 }
  0x20   : > { %p977_p13 = pneg %p976_p12  ;;  %p983_p2 = por %p982_p1, %p981_p0 }
  0x22   : > { %351 = vadd.xlane.f32.xlu0 %v350_v11  ;;  %354 = vadd.xlane.f32.xlu1 %v353_v12  ;;  %p984_p3 = pnand %p983_p2, %p977_p13 }
  0x26   : > { %266 = vadd.xlane.f32.xlu0 %v265_v14 }
  0xab   : > { %v349_v15 = vpop.xlane.xlu0 %348  ;;  %v346_v17 = vpop.xlane.xlu1 %345 }
  0xac   : > { %vm356_vm3 = vcmp.gt.f32.partialorder %v346_v17, 0.0  ;;  %vm357_vm4 = vcmp.gt.f32.partialorder %v349_v15, 0.0 }
  0xad   : > { %v360_v19 = vsel %vm356_vm3, %v346_v17, 1.0  ;;  %v361_v21 = vsel %vm357_vm4, %v349_v15, 1.0 }
  0xaf   : > { %v352_v16 = vpop.xlane.xlu0 %351  ;;  %v355_v20 = vpop.xlane.xlu1 %354 }
  0xb0   : > { %vm358_vm2 = vcmp.gt.f32.partialorder %v352_v16, 0.0  ;;  %vm359_vm5 = vcmp.gt.f32.partialorder %v355_v20, 0.0 }
  0xb1   : > { %v362_v18 = vsel %vm358_vm2, %v352_v16, 1.0  ;;  %v363_v22 = vsel %vm359_vm5, %v355_v20, 1.0 }
  0xb2   : > { %964 = vrcp.f32 %v362_v18 }
  0xb3   : > { %966 = vrcp.f32 %v360_v19  ;;  %v267_v43 = vpop.xlane.xlu0 %266 }
  0xb4   : > { %968 = vrcp.f32 %v361_v21  ;;  %vm268_vm6 = vcmp.gt.f32.partialorder %v267_v43, 0.0 }
  0xb5   : > { %970 = vrcp.f32 %v363_v22  ;;  %v269_v44 = vsel %vm268_vm6, %v267_v43, 1.0 }
  0xb6   : > { %972 = vrcp.f32 %v269_v44 }
  0xbc   : > { %v965_v23 = vpop.eup %964 }
  0xbd   : > { %v967_v24 = vpop.eup %966 }
  0xbe   : > { %v969_v27 = vpop.eup %968 }
  0xbf   : > { %v971_v39 = vpop.eup %970 }
  0xc0   : > { %v973_v48 = vpop.eup %972 }
  0xf0   : > { %v258_v26 = vpop.f32.mrb[0].mxu0 }
  0xf1   : > { %v906_v30 = vpop.f32.mrb[1].mxu0  ;;  %v271_v51 = vmul.f32 %v973_v48, %v258_v26 }
  0xf2   : > { %v912_v25 = vpop.f32.mrb[0].mxu1  ;;  %v261_v33 = vpop.f32.mrb[2].mxu0 }
  0xf3   : > { %v369_v28 = vmul.f32 %v965_v23, %v912_v25  ;;  %v325_v29 = vpop.f32.mrb[1].mxu1  ;;  %v907_v36 = vpop.f32.mrb[3].mxu0  ;;  %v274_v53 = vsel %vm268_vm6, %v271_v51, 0.0 }
  0xf4   : > { %v365_v31 = vmul.f32 %v967_v24, %v325_v29  ;;  %v913_v32 = vpop.f32.mrb[2].mxu1 }
  0xf5   : > { %v328_v34 = vpop.f32.mrb[3].mxu1  ;;  %v382_v35 = vsel %vm358_vm2, %v369_v28, 0.0  ;;  %v371_v40 = vmul.f32 %v971_v39, %v913_v32 }
  0xf6   : > { %v367_v37 = vmul.f32 %v969_v27, %v328_v34  ;;  %396 = vrot.lane.b32.xlu0 %v382_v35, %s1040_s10  ;;  %v380_v38 = vsel %vm356_vm3, %v365_v31, 0.0 }
  0xf7   : > { %385 = vrot.lane.b32.xlu1 %v380_v38, %s1040_s10  ;;  %v383_v42 = vsel %vm359_vm5, %v371_v40, 0.0 }
  0xf8   : > { %v381_v41 = vsel %vm357_vm4, %v367_v37, 0.0 }
  0xfb   : > { %391 = vrot.lane.b32.xlu1 %v381_v41, %s1040_s10 }
  0xff   : > { %401 = vrot.lane.b32.xlu1 %v383_v42, %s1040_s10 }
 0x168   : > { %v397_v54 = vpop.permute.xlu0 %396 }
 0x169   : > { %v399_v55 = vsel %vm388_vm7, %v274_v53, %v397_v54  ;;  %v386_v56 = vpop.permute.xlu1 %385 }
 0x16a   : > { %v514_v57 = vcombine.high %v399_v55, %v399_v55  ;;  %v521_v58 = vrot.slane %v399_v55, %v1144_v52  ;;  %v389_v59 = vsel %vm388_vm7, %v274_v53, %v386_v56 }
 0x16b   : > { %v406_v60 = vcombine.high %v389_v59, %v389_v59  ;;  %v413_v61 = vrot.slane %v389_v59, %v1144_v52 }
 0x16c   : > { %v528_v62 = vrot.slane %v514_v57, %v1144_v52  ;;  %v529_v63 = vcombine.high %v521_v58, %v521_v58  ;;  %v1152_v0 = vrot.slane %v521_v58, %v1144_v52 }
 0x16d   : > { %v420_v2 = vrot.slane %v406_v60, %v1144_v52  ;;  %v421_v3 = vcombine.high %v413_v61, %v413_v61  ;;  %v1158_v4 = vrot.slane %v413_v61, %v1144_v52  ;;  %v392_v5 = vpop.permute.xlu1 %391 }
 0x16e   : > { %v530_v6 = vcombine.high %v528_v62, %v528_v62  ;;  %v1161_v7 = vrot.slane %v528_v62, %v1144_v52  ;;  %v1164_v8 = vrot.slane %v529_v63, %v1144_v52  ;;  %v559_v9 = vcombine.high %v1152_v0, %v1152_v0 }
 0x16f   : > { %v422_v10 = vcombine.high %v420_v2, %v420_v2  ;;  %v656_v14 = vrot.slane %v1152_v0, %v1154_v1  ;;  %v436_v16 = vrot.slane %v420_v2, %v1144_v52  ;;  %v443_v17 = vrot.slane %v421_v3, %v1144_v52 }
 0x170   : > { %v1169_v11 = vrot.slane %v530_v6, %v1144_v52  ;;  %v560_v12 = vcombine.high %v1161_v7, %v1161_v7  ;;  %v561_v13 = vcombine.high %v1164_v8, %v1164_v8  ;;  %v660_v15 = vrot.slane %v1164_v8, %v1154_v1 }
 0x171   : > { %v402_v18 = vpop.permute.xlu1 %401  ;;  %v1182_v19 = vrot.slane %v559_v9, %v1154_v1  ;;  %v672_v20 = vrot.slane %v1161_v7, %v1154_v1  ;;  %v450_v21 = vrot.slane %v422_v10, %v1144_v52  ;;  %v451_v22 = vcombine.high %v1158_v4, %v1158_v4 }
 0x172   : > { %v562_v23 = vcombine.high %v1169_v11, %v1169_v11  ;;  %v1192_v24 = vrot.slane %v561_v13, %v1154_v1  ;;  %v676_v25 = vrot.slane %v1169_v11, %v1154_v1  ;;  %v394_v26 = vsel %vm388_vm7, %v274_v53, %v392_v5 }
 0x173   : > { %v1198_v27 = vrot.slane %v560_v12, %v1154_v1  ;;  %v464_v28 = vcombine.high %v394_v26, %v394_v26  ;;  %v471_v29 = vrot.slane %v394_v26, %v1144_v52  ;;  %v404_v30 = vsel %vm388_vm7, %v274_v53, %v402_v18 }
 0x174   : > { %v452_v31 = vcombine.high %v436_v16, %v436_v16  ;;  %v453_v32 = vcombine.high %v443_v17, %v443_v17  ;;  %v564_v33 = vcombine.high %v404_v30, %v404_v30  ;;  %v571_v34 = vrot.slane %v404_v30, %v1144_v52 }
 0x175   : > { %v454_v35 = vcombine.high %v450_v21, %v450_v21  ;;  %v478_v36 = vrot.slane %v464_v28, %v1144_v52  ;;  %v479_v37 = vcombine.high %v471_v29, %v471_v29  ;;  %v487_v38 = vrot.slane %v471_v29, %v1144_v52 }
 0x176   : > { %v684_v39 = vrot.slane %v562_v23, %v1154_v1  ;;  %v578_v40 = vrot.slane %v564_v33, %v1144_v52  ;;  %v579_v41 = vcombine.high %v571_v34, %v571_v34  ;;  %v587_v42 = vrot.slane %v571_v34, %v1144_v52 }
 0x177   : > { %v480_v43 = vcombine.high %v478_v36, %v478_v36  ;;  %v494_v44 = vrot.slane %v478_v36, %v1144_v52  ;;  %v501_v45 = vrot.slane %v479_v37, %v1144_v52  ;;  %v509_v46 = vcombine.high %v487_v38, %v487_v38 }
 0x178   : > { %v616_v47 = vrot.slane %v487_v38, %v1154_v1  ;;  %v580_v48 = vcombine.high %v578_v40, %v578_v40  ;;  %v594_v49 = vrot.slane %v578_v40, %v1144_v52  ;;  %v601_v50 = vrot.slane %v579_v41, %v1144_v52 }
 0x179   : > { %v508_v51 = vrot.slane %v480_v43, %v1144_v52  ;;  %v510_v53 = vcombine.high %v494_v44, %v494_v44  ;;  %v511_v54 = vcombine.high %v501_v45, %v501_v45  ;;  %v620_v55 = vrot.slane %v501_v45, %v1154_v1 }
 0x17a   : > { %v624_v56 = vrot.slane %v509_v46, %v1154_v1  ;;  %v632_v57 = vrot.slane %v494_v44, %v1154_v1  ;;  %v734_v58 = vsel %vm733_vm8, %v1158_v4, %v616_v47  ;;  %v608_v59 = vrot.slane %v580_v48, %v1144_v52 }
 0x17b   : > { %v512_v60 = vcombine.high %v508_v51, %v508_v51  ;;  %v628_v61 = vrot.slane %v511_v54, %v1154_v1  ;;  %v636_v62 = vrot.slane %v508_v51, %v1154_v1  ;;  %v640_v63 = vrot.slane %v510_v53, %v1154_v1 }
 0x17c   : > { %v735_v2 = vsel %vm733_vm8, %v443_v17, %v620_v55  ;;  %v736_v3 = vsel %vm733_vm8, %v451_v22, %v624_v56  ;;  %v738_v5 = vsel %vm733_vm8, %v436_v16, %v632_v57  ;;  %v609_v6 = vcombine.high %v587_v42, %v587_v42 }
 0x17d   : > { %v644_v9 = vrot.slane %v512_v60, %v1154_v1  ;;  %v737_v4 = vsel %vm733_vm8, %v453_v32, %v628_v61  ;;  %v739_v52 = vsel %vm733_vm8, %v450_v21, %v636_v62  ;;  %v740_v10 = vsel %vm733_vm8, %v452_v31, %v640_v63 }
 0x17e   : > { %v610_v12 = vcombine.high %v594_v49, %v594_v49  ;;  %v611_v13 = vcombine.high %v601_v50, %v601_v50  ;;  %v612_v18 = vcombine.high %v608_v59, %v608_v59  ;;  %v696_v17 = vrot.slane %v587_v42, %v1154_v1 }
 0x17f   : > { %v741_v22 = vsel %vm733_vm8, %v454_v35, %v644_v9  ;;  %v700_v16 = vrot.slane %v601_v50, %v1154_v1  ;;  %v704_v23 = vrot.slane %v609_v6, %v1154_v1  ;;  %v712_v26 = vrot.slane %v594_v49, %v1154_v1 }
 0x180   : > { %v708_v21 = vrot.slane %v611_v13, %v1154_v1  ;;  %v716_v28 = vrot.slane %v608_v59, %v1154_v1  ;;  %v720_v29 = vrot.slane %v610_v12, %v1154_v1  ;;  %v724_v30 = vrot.slane %v612_v18, %v1154_v1 }
 0x181   : > { %v743_v31 = vsel %vm742_vm9, %v734_v58, %v656_v14  ;;  %v744_v32 = vsel %vm742_vm9, %v735_v2, %v660_v15  ;;  %v745_v33 = vsel %vm742_vm9, %v736_v3, %v1182_v19  ;;  %v746_v34 = vsel %vm742_vm9, %v737_v4, %v1192_v24 }
 0x182   : > { %v747_v35 = vsel %vm742_vm9, %v738_v5, %v672_v20  ;;  %v748_v0 = vsel %vm742_vm9, %v739_v52, %v676_v25  ;;  %v749_v8 = vsel %vm742_vm9, %v740_v10, %v1198_v27  ;;  %v750_v14 = vsel %vm742_vm9, %v741_v22, %v684_v39 }
 0x183   : > { %v752_v15 = vsel %vm751_vm10, %v743_v31, %v696_v17  ;;  %v753_v19 = vsel %vm751_vm10, %v744_v32, %v700_v16  ;;  %v754_v7 = vsel %vm751_vm10, %v745_v33, %v704_v23  ;;  %v755_v20 = vsel %vm751_vm10, %v746_v34, %v708_v21 }
 0x184   : > { %v756_v1 = vsel %vm751_vm10, %v747_v35, %v712_v26  ;;  %v757_v11 = vsel %vm751_vm10, %v748_v0, %v716_v28  ;;  %v758_v24 = vsel %vm751_vm10, %v749_v8, %v720_v29  ;;  %v759_v25 = vsel %vm751_vm10, %v750_v14, %v724_v30 }
 0x185   : > { %v760_v27 = vpack.c.bf16 %v752_v15, %v752_v15  ;;  %v761_v36 = vpack.c.bf16 %v753_v19, %v753_v19  ;;  %v762_v37 = vpack.c.bf16 %v754_v7, %v754_v7  ;;  %v763_v38 = vpack.c.bf16 %v755_v20, %v755_v20 }
 0x186   : > { %v764_v39 = vpack.c.bf16 %v756_v1, %v756_v1  ;;  %v765_v40 = vpack.c.bf16 %v757_v11, %v757_v11  ;;  %v766_v41 = vpack.c.bf16 %v758_v24, %v758_v24  ;;  %v767_v42 = vpack.c.bf16 %v759_v25, %v759_v25 }
 0x187   : > { %768 = vst [vmem:[%s191_s20] sm:$0x3] %v760_v27  ;;  %769 = vst [vmem:[%s191_s20 + $0x2] sm:$0x3] %v761_v36 }
 0x188   : > { %770 = vst [vmem:[%s191_s20 + $0x4] sm:$0x3] %v762_v37  ;;  %771 = vst [vmem:[%s191_s20 + $0x6] sm:$0x3] %v763_v38 }
 0x189   : > { %772 = vst [vmem:[%s191_s20 + $0x8] sm:$0x3] %v764_v39  ;;  %773 = vst [vmem:[%s191_s20 + $0xa] sm:$0x3] %v765_v40 }
 0x18a   : > { %774 = vst [vmem:[%s191_s20 + $0xc] sm:$0x3] %v766_v41  ;;  %775 = vst [vmem:[%s191_s20 + $0xe] sm:$0x3] %v767_v42 }
 0x18b   : > { %987 = shalt.err (!%p984_p3)
}
 0x18c   : > { %s988_s5 = scalar_lea.hbm %s1277_s26, 256  ;;  %s992_s8 = scalar_lea.hbm %s1328_s3, 512 }
 0x18d   : > { %p989_p4 = scmp.ne.s32.totalorder %s1277_s26, %s988_s5  ;;  %p993_p9 = scmp.lt.u32.totalorder %s1277_s26, %s1328_s3 }
 0x18e   : > { %p994_p10 = scmp.lt.u32.totalorder %s992_s8, %s988_s5  ;;  %p996_p12 = scmp.lt.u32.totalorder %s988_s5, %s1277_s26 }
 0x18f   : > { %p990_p7 = pnand %p989_p4, %p1103_p5 }
 0x190   : > { %p995_p11 = por %p994_p10, %p993_p9 }
 0x191   : > { %p991_p8 = pneg %p990_p7 }
 0x192   : > { %p997_p13 = por %p996_p12, %p995_p11 }
 0x194   : > { %p998_p0 = pnand %p997_p13, %p991_p8 }
 0x196   : > { %1001 = shalt.err (!%p998_p0)
}
 0x197   : > { %s1043_s17 = smov 32   ;;  %s1044_s19 = smov 2  }
 0x198   : > { %914 = dma.vmem_to_hbm [thread:$0]  (%p1103_p5), %s1279_s24, 256, %s1277_s26, %s1283_s27, %s1043_s17, %s1040_s10, %s1044_s19  }
 0x199 PF: > { %p920_p1 = scmp.ge.s32.totalorder %s1036_s15, 2  ;;  %s804_s20 = sand.u32 1, %s1024_s12  }
 0x19a   : > { %s805_s16 = scalar_lea.sflag [#allocation3], %s804_s20 }
 0x19b   : > { %p917_p2 = pnand %p920_p1, %p1107_p6 }
 0x19d   : > { %1019 = dma.done.wait (!%p917_p2), %s805_s16, 256  }
 0x19e   : > { %1021 = vsyncadd (!%p917_p2), %s805_s16, 4294967040  ;;  %p13_p3 = scmp.ge.s32.totalorder %s1090_s18, 4   ;;  %s1331_s12 = smov %s1028_s13 }
 0x19f   : > { %s1332_s13 = smov %s1032_s14  ;;  %s1333_s14 = smov %s1101_s21 }
 0x1a0   : > { %s1334_s15 = smov %s1090_s18  ;;  %15 = sbr.rel (!%p13_p3) target bundleno = 3 (0x3), region = 73 }
 0x1a7   :  { %810 = vsyncpa [#allocation3], 1 }
 0x1a8   :  { %812 = vsyncpa [#allocation3 + $0x1], 1 }

</bundles_post_ra>
